<compile_context>
chip_gen: v7x
topology: tpu7x:2x2x1
jax: 0.10.0
libtpu: 0.0.40
codegen_flags: <defaults>
</compile_context>

<pallas_src>
import functools

import jax
import jax.numpy as jnp
from jax.experimental import pallas as pl
from jax.experimental.pallas import tpu as pltpu

LANE = 128     # lane width (last dim)
SUBLANE = 8    # f32 sublane (second-to-last dim)


def _round_up(n: int, m: int) -> int:
    return (n + m - 1) // m * m


def _choose_batch_tile(B: int, max_tile: int) -> int:
    """Balanced batch tile: pads at most SUBLANE-1 rows total, and produces
    >=2 grid steps for B >= 256 so megacore (v7x, 2 TCs) can shard the batch."""
    n_steps = max(1, pl.cdiv(B, max_tile))
    if B >= 256 and n_steps < 2:
        n_steps = 2
    return _round_up(pl.cdiv(B, n_steps), SUBLANE)


def mlp_kernel(x_ref, w1_ref, b1_ref, w2_ref, b2_ref, o_ref):
    # Linear 1: f32 MXU matmul over the tiny, unpadded K = D_in contraction;
    # bias add + ReLU stay in f32 on the VPU.
    h = jnp.dot(x_ref[...], w1_ref[...], preferred_element_type=jnp.float32)
    h = jnp.maximum(h + b1_ref[...], 0.0)
    # Linear 2: bf16 inputs, f32 MXU accumulation, lane-dense store.
    y = jnp.dot(h.astype(w2_ref.dtype), w2_ref[...],
                preferred_element_type=jnp.float32)
    o_ref[...] = (y + b2_ref[...]).astype(o_ref.dtype)


def prepare_params(w1, b1, w2, b2, *, matmul_dtype=jnp.bfloat16):
    """One-time parameter preparation (call at init, NOT per forward call).

    Pads the hidden / output feature dims to lane multiples so both matmuls
    are full-width MXU passes and the output store is lane-dense, and casts
    the second-layer weight to the matmul dtype.
    """
    D_in, H = w1.shape
    Hw, D_out = w2.shape
    assert H == Hw
    H_p = _round_up(H, LANE)
    D_out_p = _round_up(D_out, LANE)

    w1_p = jnp.pad(w1.astype(jnp.float32), ((0, 0), (0, H_p - H)))
    b1_p = jnp.pad(b1.astype(jnp.float32).reshape(1, H),
                   ((0, 0), (0, H_p - H)))
    w2_p = jnp.pad(w2, ((0, H_p - H), (0, D_out_p - D_out))).astype(matmul_dtype)
    b2_p = jnp.pad(b2.astype(jnp.float32).reshape(1, D_out),
                   ((0, 0), (0, D_out_p - D_out)))
    return w1_p, b1_p, w2_p, b2_p


@functools.partial(jax.jit, static_argnames=("out_dtype", "max_batch_tile"))
def my_sequential_forward(x, w1_p, b1_p, w2_p, b2_p, *,
                          out_dtype=jnp.bfloat16, max_batch_tile=2048):
    """Fused Linear -> ReLU -> Linear forward.

    x     : (B, D_in) f32, unpadded.
    w1_p  : (D_in, H_p)  f32   (pre-padded, from prepare_params)
    b1_p  : (1, H_p)     f32
    w2_p  : (H_p, D_out_p) bf16
    b2_p  : (1, D_out_p) f32

    Returns the padded (B_p, D_out_p) slab in `out_dtype`; slice
    `out[:B, :D_out]` lazily at the consumer (padded batch rows hold
    relu(b1) @ W2 + b2 and must be stripped before use).
    """
    B, D_in = x.shape
    D_in_w, H_p = w1_p.shape
    H_p2, D_out_p = w2_p.shape
    assert D_in == D_in_w and H_p == H_p2

    TB = _choose_batch_tile(B, max_batch_tile)
    B_p = _round_up(B, TB)
    if B_p != B:
        # Batch-only padding (at most TB-1 < balanced-tile rows); feature dim
        # stays unpadded -> minimal extra x traffic.
        x = jnp.pad(x, ((0, B_p - B), (0, 0)))

    grid = (B_p // TB,)

    return pl.pallas_call(
        mlp_kernel,
        out_shape=jax.ShapeDtypeStruct((B_p, D_out_p), out_dtype),
        grid=grid,
        in_specs=[
            # Batch-tiled activations, unpadded feature dim (pipelined).
            pl.BlockSpec((TB, D_in), lambda i: (i, 0)),
            # Weights / biases: constant index_map -> VMEM-resident.
            pl.BlockSpec((D_in, H_p), lambda i: (0, 0)),
            pl.BlockSpec((1, H_p), lambda i: (0, 0)),
            pl.BlockSpec((H_p, D_out_p), lambda i: (0, 0)),
            pl.BlockSpec((1, D_out_p), lambda i: (0, 0)),
        ],
        out_specs=pl.BlockSpec((TB, D_out_p), lambda i: (i, 0)),
        compiler_params=pltpu.CompilerParams(
            dimension_semantics=("parallel",)),
    )(x, w1_p, b1_p, w2_p, b2_p)


def reference_forward(x, w1, b1, w2, b2):
    h = jnp.maximum(x @ w1 + b1.reshape(1, -1), 0.0)
    return h @ w2 + b2.reshape(1, -1)


if __name__ == "__main__":
    # Canonical MySequential instantiation: Linear(20,256) -> ReLU -> Linear(256,10)
    # TODO(synk): MySequential is a generic container; only the canonical
    # Linear->ReLU->Linear instantiation is implemented here.
    B, D_in, H, D_out = 8, 20, 256, 10

    key = jax.random.PRNGKey(0)
    k_x, k_w1, k_b1, k_w2, k_b2 = jax.random.split(key, 5)

    x = jax.random.normal(k_x, (B, D_in), dtype=jnp.float32)
    # Deterministic parameter init (Kaiming-ish scale), weights as (in, out).
    w1 = jax.random.normal(k_w1, (D_in, H), dtype=jnp.float32) * (1.0 / D_in) ** 0.5
    b1 = jax.random.normal(k_b1, (H,), dtype=jnp.float32) * 0.01
    w2 = jax.random.normal(k_w2, (H, D_out), dtype=jnp.float32) * (1.0 / H) ** 0.5
    b2 = jax.random.normal(k_b2, (D_out,), dtype=jnp.float32) * 0.01

    # Pad / cast parameters ONCE (this is the "init" path, not the call path).
    w1_p, b1_p, w2_p, b2_p = prepare_params(w1, b1, w2, b2)

    out_padded = my_sequential_forward(x, w1_p, b1_p, w2_p, b2_p)
    out_padded = jax.block_until_ready(out_padded)

    # Consumer-side lazy slice of the padded slab.
    out = out_padded[:B, :D_out].astype(jnp.float32)
    ref = reference_forward(x, w1, b1, w2, b2)

    assert out.shape == (B, D_out)
    # bf16 second matmul + bf16 output: allow bf16-level tolerance.
    assert jnp.allclose(out, ref, atol=3e-2, rtol=3e-2), (
        float(jnp.max(jnp.abs(out - ref))))

    print("KERNEL_OK")
</pallas_src>

<mosaic_0001>
module attributes {stable_mosaic.version = 11 : i64} {
  func.func @mlp_kernel(%arg0: i32, %arg1: memref<8x20xf32, #tpu.memory_space<vmem>>, %arg2: memref<20x256xf32, #tpu.memory_space<vmem>>, %arg3: memref<1x256xf32, #tpu.memory_space<vmem>>, %arg4: memref<256x128xbf16, #tpu.memory_space<vmem>>, %arg5: memref<1x128xf32, #tpu.memory_space<vmem>>, %arg6: memref<8x128xbf16, #tpu.memory_space<vmem>>) attributes {dimension_semantics = [#tpu.dimension_semantics<parallel>], iteration_bounds = array<i64: 1>, scalar_prefetch = 0 : i64, scratch_operands = 0 : i64, tpu.core_type = #tpu.core_type<tc>, window_params = [{transform_indices = @transform_0, window_bounds = array<i64: 8, 20>}, {pipeline_mode = #tpu.pipeline_mode<synchronous>, transform_indices = @transform_1, window_bounds = array<i64: 20, 256>}, {pipeline_mode = #tpu.pipeline_mode<synchronous>, transform_indices = @transform_2, window_bounds = array<i64: 1, 256>}, {pipeline_mode = #tpu.pipeline_mode<synchronous>, transform_indices = @transform_3, window_bounds = array<i64: 256, 128>}, {pipeline_mode = #tpu.pipeline_mode<synchronous>, transform_indices = @transform_4, window_bounds = array<i64: 1, 128>}, {transform_indices = @transform_5, window_bounds = array<i64: 8, 128>}]} {
    %c0 = arith.constant 0 : index
    %c0_0 = arith.constant 0 : index
    %0 = vector.load %arg1[%c0, %c0_0] : memref<8x20xf32, #tpu.memory_space<vmem>>, vector<8x20xf32>
    %c0_1 = arith.constant 0 : index
    %c0_2 = arith.constant 0 : index
    %1 = vector.load %arg2[%c0_1, %c0_2] : memref<20x256xf32, #tpu.memory_space<vmem>>, vector<20x256xf32>
    %cst = arith.constant dense<0.000000e+00> : vector<8x256xf32>
    %2 = tpu.matmul %0, %1, %cst {dimension_numbers = #tpu.dot_dimension_numbers<[1], [0], [0], [1], [0, 0, 1, 1], [], []>} : vector<8x20xf32>, vector<20x256xf32>, vector<8x256xf32> -> vector<8x256xf32>
    %c0_3 = arith.constant 0 : index
    %c0_4 = arith.constant 0 : index
    %3 = vector.load %arg3[%c0_3, %c0_4] : memref<1x256xf32, #tpu.memory_space<vmem>>, vector<1x256xf32>
    %4 = vector.broadcast %3 : vector<1x256xf32> to vector<8x256xf32>
    %5 = arith.addf %2, %4 : vector<8x256xf32>
    %cst_5 = arith.constant 0.000000e+00 : f32
    %6 = vector.broadcast %cst_5 : f32 to vector<8x256xf32>
    %7 = arith.maximumf %5, %6 : vector<8x256xf32>
    %8 = arith.truncf %7 : vector<8x256xf32> to vector<8x256xbf16>
    %c0_6 = arith.constant 0 : index
    %c0_7 = arith.constant 0 : index
    %9 = vector.load %arg4[%c0_6, %c0_7] : memref<256x128xbf16, #tpu.memory_space<vmem>>, vector<256x128xbf16>
    %cst_8 = arith.constant dense<0.000000e+00> : vector<8x128xf32>
    %10 = tpu.matmul %8, %9, %cst_8 {dimension_numbers = #tpu.dot_dimension_numbers<[1], [0], [0], [1], [0, 0, 1, 1], [], []>} : vector<8x256xbf16>, vector<256x128xbf16>, vector<8x128xf32> -> vector<8x128xf32>
    %c0_9 = arith.constant 0 : index
    %c0_10 = arith.constant 0 : index
    %11 = vector.load %arg5[%c0_9, %c0_10] : memref<1x128xf32, #tpu.memory_space<vmem>>, vector<1x128xf32>
    %12 = vector.broadcast %11 : vector<1x128xf32> to vector<8x128xf32>
    %13 = arith.addf %10, %12 : vector<8x128xf32>
    %14 = arith.truncf %13 : vector<8x128xf32> to vector<8x128xbf16>
    %c0_11 = arith.constant 0 : index
    %c0_12 = arith.constant 0 : index
    %15 = vector.load %arg6[%c0_11, %c0_12] : memref<8x128xbf16, #tpu.memory_space<vmem>>, vector<8x128xbf16>
    tpu.vector_store %arg6[%c0_11, %c0_12], %14 {strides = array<i32>} : memref<8x128xbf16, #tpu.memory_space<vmem>>, vector<8x128xbf16>,
    return
  }
  func.func @transform_0(%arg0: i32) -> (i32, i32) {
    %c0_i32 = arith.constant 0 : i32
    %c0_i32_0 = arith.constant 0 : i32
    return %arg0, %c0_i32 : i32, i32
  }
  func.func @transform_1(%arg0: i32) -> (i32, i32) {
    %c0_i32 = arith.constant 0 : i32
    %c0_i32_0 = arith.constant 0 : i32
    %c0_i32_1 = arith.constant 0 : i32
    return %c0_i32, %c0_i32_0 : i32, i32
  }
  func.func @transform_2(%arg0: i32) -> (i32, i32) {
    %c0_i32 = arith.constant 0 : i32
    %c0_i32_0 = arith.constant 0 : i32
    %c0_i32_1 = arith.constant 0 : i32
    return %c0_i32, %c0_i32_0 : i32, i32
  }
  func.func @transform_3(%arg0: i32) -> (i32, i32) {
    %c0_i32 = arith.constant 0 : i32
    %c0_i32_0 = arith.constant 0 : i32
    %c0_i32_1 = arith.constant 0 : i32
    return %c0_i32, %c0_i32_0 : i32, i32
  }
  func.func @transform_4(%arg0: i32) -> (i32, i32) {
    %c0_i32 = arith.constant 0 : i32
    %c0_i32_0 = arith.constant 0 : i32
    %c0_i32_1 = arith.constant 0 : i32
    return %c0_i32, %c0_i32_0 : i32, i32
  }
  func.func @transform_5(%arg0: i32) -> (i32, i32) {
    %c0_i32 = arith.constant 0 : i32
    %c0_i32_0 = arith.constant 0 : i32
    return %arg0, %c0_i32 : i32, i32
  }
}

</mosaic_0001>

<bundles_post_ra>
// kernel: my_sequential_forward.1
= control target key start
LH: loop header
LB: loop body
LE: loop exit
PB: predicated region body
PF: predicated region fallthrough
CT: control target
= control target key end

     0   :  { %10 = vsyncpa [#allocation3], 0  ;;  %s619_s0 = inlined_call_operand.hbm [shape: f32[8,20], index: 0, kind: input, shape index: {}]   ;;  %s620_s1 = inlined_call_operand.hbm [shape: f32[20,256], index: 1, kind: input, shape index: {}]   ;;  %s621_s2 = inlined_call_operand.vmem [shape: f32[1,256], index: 2, kind: input, shape index: {}]   ;;  %s622_s3 = inlined_call_operand.hbm [shape: bf16[256,128], index: 3, kind: input, shape index: {}]   ;;  %s623_s4 = inlined_call_operand.vmem [shape: f32[1,128], index: 4, kind: input, shape index: {}]   ;;  %s624_s5 = inlined_call_operand.hbm [shape: bf16[8,128], index: 5, kind: output, shape index: {}]  }
   0x1   :  { %11 = vsyncpa [#allocation6], 0 }
   0x2   :  { %12 = vsyncpa [#allocation4], 0  ;;  %s524_s18 = smov [#allocation5]   ;;  %s430_s22 = scalar_lea.hbm %s620_s1, 768 }
   0x3   :  { %s28_s19 = sshll.u32 %s524_s18, 4  ;;  %p431_p0 = scmp.ne.s32.totalorder %s620_s1, %s430_s22  ;;  %s29_s19 = int_to_ptr.vmem [resolvable:$true] %s28_s19 }
   0x4   :  { %p434_p1 = scmp.lt.u32.totalorder %s430_s22, %s620_s1 }
   0x6   :  { %p436_p2 = pnand %p434_p1, %p431_p0 }
   0x8   :  { %439 = shalt.err (!%p436_p2)
}
   0x9   :  { %s440_s27 = scalar_lea.vmem %s29_s19, 768  ;;  %p445_p4 = scmp.lt.s32.totalorder %s29_s19, %s29_s19 }
   0xa   :  { %p441_p3 = scmp.ne.s32.totalorder %s29_s19, %s440_s27  ;;  %p446_p5 = scmp.lt.s32.totalorder %s440_s27, %s440_s27 }
   0xc   :  { %p447_p6 = por %p446_p5, %p445_p4 }
   0xe   :  { %p448_p7 = pnand %p447_p6, %p441_p3 }
  0x10   :  { %451 = shalt.err (!%p448_p7)
}
  0x11   :  { %s525_s28 = smov 256   ;;  %s526_s29 = smov 16  }
  0x12   :  { %34 = dma.hbm_to_vmem [thread:$0]  %s620_s1, 768, %s29_s19, [#allocation6], %s525_s28, %s525_s28, %s526_s29  }
  0x13   :  { %s527_s7 = smov [#allocation2]   ;;  %s528_s9 = smov [#allocation7]  }
  0x14   :  { %s19_s8 = sshll.u32 %s527_s7, 4  ;;  %s42_s10 = sshll.u32 %s528_s9, 4  ;;  %s20_s8 = int_to_ptr.vmem [resolvable:$true] %s19_s8  ;;  %s43_s10 = int_to_ptr.vmem [resolvable:$true] %s42_s10 }
  0x15   :  { %s452_s13 = scalar_lea.hbm %s619_s0, 128 }
  0x16   :  { %p453_p8 = scmp.ne.s32.totalorder %s619_s0, %s452_s13  ;;  %p456_p9 = scmp.lt.u32.totalorder %s452_s13, %s619_s0 }
  0x18   :  { %p458_p10 = pnand %p456_p9, %p453_p8 }
  0x1a   :  { %461 = shalt.err (!%p458_p10)
}
  0x1b   :  { %s462_s1 = scalar_lea.vmem %s20_s8, 128  ;;  %p467_p12 = scmp.lt.s32.totalorder %s20_s8, %s20_s8 }
  0x1c   :  { %p463_p11 = scmp.ne.s32.totalorder %s20_s8, %s462_s1  ;;  %p468_p13 = scmp.lt.s32.totalorder %s462_s1, %s462_s1 }
  0x1e   :  { %p469_p0 = por %p468_p13, %p467_p12 }
  0x20   :  { %p470_p1 = pnand %p469_p0, %p463_p11 }
  0x22   :  { %473 = shalt.err (!%p470_p1)
}
  0x23   :  { %22 = dma.hbm_to_vmem [thread:$0]  %s619_s0, 128, %s20_s8, [#allocation3]  }
  0x24   :  { %s474_s22 = scalar_lea.hbm %s622_s3, 2048 }
  0x25   :  { %p475_p2 = scmp.ne.s32.totalorder %s622_s3, %s474_s22  ;;  %p478_p3 = scmp.lt.u32.totalorder %s474_s22, %s622_s3 }
  0x27   :  { %p480_p4 = pnand %p478_p3, %p475_p2 }
  0x29   :  { %483 = shalt.err (!%p480_p4)
}
  0x2a   :  { %s484_s27 = scalar_lea.vmem %s43_s10, 2048  ;;  %p489_p6 = scmp.lt.s32.totalorder %s43_s10, %s43_s10 }
  0x2b   :  { %p485_p5 = scmp.ne.s32.totalorder %s43_s10, %s484_s27  ;;  %p490_p7 = scmp.lt.s32.totalorder %s484_s27, %s484_s27 }
  0x2d   :  { %p491_p8 = por %p490_p7, %p489_p6 }
  0x2f   :  { %p492_p9 = pnand %p491_p8, %p485_p5 }
  0x31   :  { %495 = shalt.err (!%p492_p9)
}
  0x32   :  { %s529_s0 = smov 64   ;;  %s530_s28 = smov 4  }
  0x33   :  { %48 = dma.hbm_to_vmem [thread:$0]  %s622_s3, 2048, %s43_s10, [#allocation6], %s529_s0, %s529_s0, %s530_s28  }
  0x34   :  { %518 = dma.done.wait [#allocation3], 128  }
  0x35   :  { %519 = vsyncadd [#allocation3], 4294967168 }
  0x36   :  { %520 = dma.done.wait [#allocation6], 2816  }
  0x37   :  { %521 = vsyncadd [#allocation6], 4294964480  ;;  %v531_v0 = vmov 0.0   ;;  %v63_v1 = vld [vmem:[#allocation5 + $0x8] sm:$0xff]  ;;  %v65_v2 = vld [vmem:[#allocation5 + $0x18] sm:$0xff]  ;;  %vm84_vm0 = vcmask 1043456   ;;  %v70_v26 = vlaneseq }
  0x38   :  { %155 = vmatprep.mubr.f32.mxu0 %v531_v0  ;;  %v62_v3 = vld [vmem:[#allocation5] sm:$0xff]  ;;  %v401_v4 = vpack.c.bf16 %v65_v2, %v63_v1  ;;  %v64_v5 = vld [vmem:[#allocation5 + $0x10] sm:$0xff]  ;;  %v67_v7 = vld [vmem:[#allocation5 + $0x28] sm:$0xf]  ;;  %vm80_vm1 = vcmask 162816  }
  0x39   :  { %v403_v6 = vpack.c.bf16 %v64_v5, %v62_v3  ;;  %v66_v8 = vld [vmem:[#allocation5 + $0x20] sm:$0xf]  ;;  %v414_v9 = vld [vmem:[#allocation7 + $0x40] sm:$0xff]   ;;  %v61_v10 = vld [vmem:[#allocation2] sm:$0xff]  ;;  %v71_v27 = vshrl.u32 %v70_v26, 7 }
  0x3a   :  { %402 = vmatprep.subr.bf16.mxu0 %v401_v4  ;;  %v415_v11 = vld [vmem:[#allocation7] sm:$0xff]   ;;  %379 = vmatprep.subr.bf16.mxu1 %v414_v9  ;;  %v416_v12 = vld [vmem:[#allocation7 + $0x48] sm:$0xff]   ;;  %v418_v14 = vld [vmem:[#allocation7 + $0x50] sm:$0xff]  }
  0x3b   :  { %404 = vmatpush1.bf16.msra.mxu0 %v403_v6  ;;  %380 = vmatpush3.bf16.msra.mxu1 %v415_v11  ;;  %v417_v13 = vld [vmem:[#allocation7 + $0x8] sm:$0xff]   ;;  %v419_v15 = vld [vmem:[#allocation7 + $0x10] sm:$0xff]   ;;  %v420_v16 = vld [vmem:[#allocation7 + $0x58] sm:$0xff]   ;;  %v72_v28 = vsub.s32 0, %v71_v27  ;;  %v76_v30 = vsub.s32 1, %v71_v27 }
  0x3c   :  { %359 = vmatprep.subr.msk.mxu0 %vm84_vm0, %v67_v7  ;;  %381 = vmatprep.subr.bf16.mxu1 %v416_v12  ;;  %v421_v17 = vld [vmem:[#allocation7 + $0x18] sm:$0xff]   ;;  %v422_v18 = vld [vmem:[#allocation7 + $0x60] sm:$0xff]   ;;  %v424_v20 = vld [vmem:[#allocation7 + $0x68] sm:$0xff]  }
  0x3d   :  { %v423_v19 = vld [vmem:[#allocation7 + $0x20] sm:$0xff]   ;;  %v425_v21 = vld [vmem:[#allocation7 + $0x28] sm:$0xff]   ;;  %v426_v22 = vld [vmem:[#allocation7 + $0x70] sm:$0xff]  }
  0x3e   :  { %v427_v23 = vld [vmem:[#allocation7 + $0x30] sm:$0xff]   ;;  %v428_v24 = vld [vmem:[#allocation7 + $0x78] sm:$0xff]   ;;  %v68_v29 = vld [vmem:[%s621_s2] sm:$0x3]  ;;  %s532_s2 = smov [#allocation8]  }
  0x3f   :  { %360 = vmatpush1.msk.msra.mxu0 %vm84_vm0, %v66_v8  ;;  %382 = vmatpush3.bf16.msra.mxu1 %v417_v13  ;;  %v429_v25 = vld [vmem:[#allocation7 + $0x38] sm:$0xff]   ;;  %v73_v31 = vrot.slane %v68_v29, %v72_v28  ;;  %v77_v32 = vrot.slane %v68_v29, %v76_v30  ;;  %v362_v42 = vld [vmem:[%s623_s4] ss:$0 sm:$0xff]  ;;  %s349_s9 = sshll.u32 %s532_s2, 4  ;;  %s350_s9 = int_to_ptr.vmem [resolvable:$true] %s349_s9 }
  0x40   :  { %361 = vmatmul.mubr.msk.f32.vlgmr.msra.gmra.mrb[0].mxu0 %vm80_vm1, %v61_v10  ;;  %383 = vmatprep.subr.bf16.mxu1 %v418_v14  ;;  %s496_s10 = scalar_lea.vmem %s350_s9, 64  ;;  %p501_p11 = scmp.lt.s32.totalorder %s350_s9, %s350_s9 }
  0x41   :  { %p497_p10 = scmp.ne.s32.totalorder %s350_s9, %s496_s10  ;;  %p502_p12 = scmp.lt.s32.totalorder %s496_s10, %s496_s10 }
  0x43   :  { %384 = vmatpush3.bf16.msra.mxu1 %v419_v15  ;;  %p503_p13 = por %p502_p12, %p501_p11 }
  0x44   :  { %385 = vmatprep.subr.bf16.mxu1 %v420_v16 }
  0x45   :  { %p504_p0 = pnand %p503_p13, %p497_p10 }
  0x47   :  { %386 = vmatpush3.bf16.msra.mxu1 %v421_v17 }
  0x48   :  { %387 = vmatprep.subr.bf16.mxu1 %v422_v18 }
  0x4b   :  { %388 = vmatpush3.bf16.msra.mxu1 %v423_v19 }
  0x4c   :  { %389 = vmatprep.subr.bf16.mxu1 %v424_v20 }
  0x4f   :  { %390 = vmatpush3.bf16.msra.mxu1 %v425_v21 }
  0x50   :  { %391 = vmatprep.subr.bf16.mxu1 %v426_v22 }
  0x53   :  { %392 = vmatpush3.bf16.msra.mxu1 %v427_v23 }
  0x54   :  { %393 = vmatprep.subr.bf16.mxu1 %v428_v24 }
  0x57   :  { %394 = vmatpush3.bf16.msra.mxu1 %v429_v25 }
 0x113   :  { %v157_v33 = vpop.f32.mrb[0].mxu0 }
 0x114   :  { %v158_v34 = vadd.f32 %v157_v33, %v73_v31  ;;  %v159_v35 = vpop.f32.mrb[1].mxu0 }
 0x115   :  { %v160_v36 = vadd.f32 %v159_v35, %v77_v32 }
 0x116   :  { %v162_v37 = vmax.f32 %v158_v34, 0.0 }
 0x117   :  { %v163_v38 = vmax.f32 %v160_v36, 0.0 }
 0x118   :  { %v164_v40 = vpack.c.bf16 %v162_v37, %v162_v37 }
 0x119   :  { %v165_v39 = vpack.c.bf16 %v163_v38, %v163_v38 }
 0x11b   :  { %333 = vmatprep.mubr.bf16.mxu1 %v165_v39 }
 0x11c   :  { %334 = vmatmul.mubr.bf16.vlgmr.msra.gmra.mrb[0].mxu1 %v164_v40 }
 0x1ef   :  { %v395_v41 = vpop.f32.mrb[0].mxu1 }
 0x1f0   :  { %v396_v43 = vpop.f32.mrb[1].mxu1 }
 0x1f1   :  { %v397_v44 = vadd.f32 %v396_v43, %v395_v41  ;;  %v398_v45 = vpop.f32.mrb[2].mxu1 }
 0x1f2   :  { %v399_v46 = vpop.f32.mrb[3].mxu1 }
 0x1f3   :  { %v336_v47 = vadd.f32 %v397_v44, %v362_v42 }
 0x1f5   :  { %v341_v48 = vpack.c.bf16 %v336_v47, %v336_v47 }
 0x1f7   :  { %342 = vst [vmem:[#allocation8] sm:$0xf] %v341_v48 }
 0x1f8   :  { %507 = shalt.err (!%p504_p0)
}
 0x1f9   :  { %s508_s4 = scalar_lea.hbm %s624_s5, 64 }
 0x1fa   :  { %p509_p1 = scmp.ne.s32.totalorder %s624_s5, %s508_s4  ;;  %p512_p2 = scmp.lt.u32.totalorder %s508_s4, %s624_s5 }
 0x1fc   :  { %p514_p3 = pnand %p512_p2, %p509_p1 }
 0x1fe   :  { %517 = shalt.err (!%p514_p3)
}
 0x1ff   :  { %352 = dma.vmem_to_hbm [thread:$0]  %s350_s9, 64, %s624_s5, [#allocation4]  }
 0x200   :  { %522 = dma.done.wait [#allocation4], 64  }
 0x201   :  { %523 = vsyncadd [#allocation4], 4294967232 }
 0x202   :  { %356 = vsyncpa [#allocation3], 1 }
 0x203   :  { %357 = vsyncpa [#allocation6], 1 }
 0x204   :  { %358 = vsyncpa [#allocation4], 1 }

</bundles_post_ra>
